<compile_context>
chip_gen: v7x
topology: tpu7x:2x2x1
jax: 0.10.0
libtpu: 0.0.40
codegen_flags: <defaults>
</compile_context>

<pallas_src>
import functools
import numpy as np

import jax
import jax.numpy as jnp
from jax import lax
from jax.experimental import pallas as pl
from jax.experimental.pallas import tpu as pltpu


def _round_up(x, m):
    return (x + m - 1) // m * m


_VMEM_LIMIT = 32 * 1024 * 1024  # fits v5e/v6e/v7x scoped VMEM with headroom


# ----------------------------------------------------------------------------
# Kernel 1: pairwise IoU with time masking (torchvision.ops.box_iou semantics)
# Row-tiled: each grid step produces a (tm, Nc) lane-dense slab of the matrix.
# ----------------------------------------------------------------------------
def _iou_kernel(x1r_ref, y1r_ref, x2r_ref, y2r_ref, tr_ref,
                x1c_ref, y1c_ref, x2c_ref, y2c_ref, tc_ref, o_ref):
    x1a, y1a, x2a, y2a = x1r_ref[...], y1r_ref[...], x2r_ref[...], y2r_ref[...]  # (tm,1)
    x1b, y1b, x2b, y2b = x1c_ref[...], y1c_ref[...], x2c_ref[...], y2c_ref[...]  # (1,Nc)
    lt_x = jnp.maximum(x1a, x1b)
    lt_y = jnp.maximum(y1a, y1b)
    rb_x = jnp.minimum(x2a, x2b)
    rb_y = jnp.minimum(y2a, y2b)
    inter = jnp.maximum(rb_x - lt_x, 0.0) * jnp.maximum(rb_y - lt_y, 0.0)
    area_a = (x2a - x1a) * (y2a - y1a)     # (tm, 1)
    area_b = (x2b - x1b) * (y2b - y1b)     # (1, Nc)
    union = area_a + area_b - inter
    # NOTE: like torchvision, degenerate boxes (union == 0) give inf/NaN; the
    # wrapper pads with valid dummy boxes so padded entries are well defined.
    iou = inter * pl.reciprocal(union, approx=True)
    same_t = tr_ref[...] == tc_ref[...]    # (tm,1) vs (1,Nc) -> (tm,Nc), int32 cmp
    o_ref[...] = jnp.where(same_t, iou, -1.0)


def pairwise_iou(boxes, times, *, row_tile=256):
    """boxes (N,4) f32, times (N,) int -> (N,N) IoU, -1 across frames."""
    N = boxes.shape[0]
    boxes = boxes.astype(jnp.float32)
    times = times.astype(jnp.int32)

    tm = min(row_tile, _round_up(N, 8))
    Nr = _round_up(N, tm)       # rows padded to tile multiple (>= multiple of 8)
    Nc = _round_up(N, 128)      # cols padded -> lane-dense unmasked stores

    def pad_rows(v, fill):
        return jnp.pad(v, ((0, Nr - N), (0, 0)), constant_values=fill)

    def pad_cols(v, fill):
        return jnp.pad(v, ((0, 0), (0, Nc - N)), constant_values=fill)

    x1, y1, x2, y2 = boxes[:, 0:1], boxes[:, 1:2], boxes[:, 2:3], boxes[:, 3:4]
    # pad with a valid dummy box (0,0,1,1) so union > 0, and time = -1 (no real frame)
    row_ops = [pad_rows(x1, 0.0), pad_rows(y1, 0.0),
               pad_rows(x2, 1.0), pad_rows(y2, 1.0),
               pad_rows(times.reshape(N, 1), -1)]
    col_ops = [pad_cols(x1.T, 0.0), pad_cols(y1.T, 0.0),
               pad_cols(x2.T, 1.0), pad_cols(y2.T, 1.0),
               pad_cols(times.reshape(1, N), -1)]

    row_spec = pl.BlockSpec((tm, 1), lambda i: (i, 0))
    col_spec = pl.BlockSpec((1, Nc), lambda i: (0, 0))
    out = pl.pallas_call(
        _iou_kernel,
        out_shape=jax.ShapeDtypeStruct((Nr, Nc), jnp.float32),
        grid=(Nr // tm,),
        in_specs=[row_spec] * 5 + [col_spec] * 5,
        out_specs=pl.BlockSpec((tm, Nc), lambda i: (i, 0)),
        compiler_params=pltpu.CompilerParams(
            dimension_semantics=("parallel",),
            vmem_limit_bytes=_VMEM_LIMIT),
    )(*row_ops, *col_ops)
    return out[:N, :N]


# ----------------------------------------------------------------------------
# Kernel 2: summed per-frame logsumexp term of the cross-entropy
#   partial[i_tile] = sum_{rows in tile} row_mask * sum_t logsumexp([pred_t, 0])
# Lane-dense (tm, Npad) blocks; one exp pass; per-frame sums via one MXU matmul
# against a block-diagonal frame indicator.
# ----------------------------------------------------------------------------
def _ce_kernel(pred_ref, ind_ref, rmask_ref, o_ref, *, num_frames):
    logits = pred_ref[...]                                            # (tm, Np) f32
    m = jnp.maximum(jnp.max(logits, axis=1, keepdims=True), 0.0)      # bg logit = 0
    e = jnp.exp(logits - m)                                           # EUP, one pass
    s = jnp.dot(e, ind_ref[...], preferred_element_type=jnp.float32)  # (tm, Tp) MXU
    lse = m + jnp.log(s + jnp.exp(-m))                                # (tm, Tp)
    t_idx = lax.broadcasted_iota(jnp.int32, lse.shape, 1)
    lse = jnp.where(t_idx < num_frames, lse, 0.0)                     # drop padded frames
    per_row = jnp.sum(lse, axis=1, keepdims=True)                     # (tm, 1)
    o_ref[...] = jnp.sum(rmask_ref[...] * per_row).reshape(1, 1)


def ce_lse_sum(pred, row_mask, n_per, T, *, row_tile=256):
    """sum_i row_mask[i] * sum_t logsumexp([pred[i, t*n_per:(t+1)*n_per], 0])."""
    M, N = pred.shape
    tm = min(row_tile, _round_up(M, 8))
    Mp = _round_up(M, tm)
    Np = _round_up(N, 128)
    Tp = _round_up(max(T, 1), 128)

    pred_p = jnp.pad(pred.astype(jnp.float32), ((0, Mp - M), (0, Np - N)))
    rmask_p = jnp.pad(row_mask.astype(jnp.float32).reshape(M, 1), ((0, Mp - M), (0, 0)))

    # frame indicator (Np, Tp): ind[j, t] = 1 iff detection j belongs to frame t
    col = np.arange(Np)
    ind = ((col[:, None] < N) &
           ((col[:, None] // n_per) == np.arange(Tp)[None, :])).astype(np.float32)
    ind = jnp.asarray(ind)

    out = pl.pallas_call(
        functools.partial(_ce_kernel, num_frames=T),
        out_shape=jax.ShapeDtypeStruct((Mp // tm, 1), jnp.float32),
        grid=(Mp // tm,),
        in_specs=[
            pl.BlockSpec((tm, Np), lambda i: (i, 0)),
            pl.BlockSpec((Np, Tp), lambda i: (0, 0)),
            pl.BlockSpec((tm, 1), lambda i: (i, 0)),
        ],
        out_specs=pl.BlockSpec((1, 1), lambda i: (i, 0)),
        compiler_params=pltpu.CompilerParams(
            dimension_semantics=("parallel",),
            vmem_limit_bytes=_VMEM_LIMIT),
    )(pred_p, ind, rmask_p)
    return jnp.sum(out)


# ----------------------------------------------------------------------------
# Glue: GT association assignment (_get_asso_gt), vectorized in plain JAX.
# Assumes uniform n_per detections per frame and each track id appears at most
# once per frame (the PyTorch code asserts the latter).
# ----------------------------------------------------------------------------
def get_asso_gt(ious, target_inst_id, inst_ids, T, n_per):
    N = ious.shape[0]

    def per_kt(inst_id, t):
        col_mask = target_inst_id == inst_id                          # (N,)
        rows = lax.dynamic_slice(ious, (t * n_per, 0), (n_per, N))    # frame-t rows
        masked = jnp.where(col_mask[None, :], rows, -jnp.inf)
        col_max = jnp.max(masked, axis=0)
        row_arg = jnp.argmax(masked, axis=0)
        has = col_max > 0.0
        any_has = jnp.any(has)
        j = jnp.argmax(has)                                           # at most one hit
        obj_ind = row_arg[j]
        gt = jnp.where(any_has, obj_ind, n_per).astype(jnp.int32)     # n_per == background
        gind = jnp.where(any_has, t * n_per + obj_ind, -1).astype(jnp.int32)
        return gt, gind

    per_k = jax.vmap(per_kt, in_axes=(None, 0))
    asso_gt, ginds = jax.vmap(per_k, in_axes=(0, None))(
        inst_ids, jnp.arange(T, dtype=jnp.int32))                     # (K, T) each

    K = inst_ids.shape[0]
    match_cues = jnp.full((N,), -1, jnp.int32)
    k_ids = jnp.broadcast_to(jnp.arange(K, dtype=jnp.int32)[:, None], (K, T))
    idx = jnp.where(ginds >= 0, ginds, N)                 # N = out-of-bounds -> dropped
    match_cues = match_cues.at[idx.reshape(-1)].set(k_ids.reshape(-1), mode="drop")
    return asso_gt, match_cues


def asso_loss(asso_preds, boxes, times, gt_track_ids, inst_ids, n_per, T,
              neg_unmatched=False, epsilon=1e-4, asso_weight=1.0):
    # TODO(synk): neg_unmatched=True branch not implemented (module default is False).
    assert not neg_unmatched

    pred_box = jnp.nanmean(boxes.astype(jnp.float32), axis=1)         # (N, 4)
    ious = pairwise_iou(pred_box, times)                              # Pallas kernel 1
    asso_gt, match_cues = get_asso_gt(ious, gt_track_ids, inst_ids, T, n_per)

    # NOTE: assumes M == N (query instances == detections), as in the GTR model.
    src_mask = match_cues >= 0                                        # matched rows (N,)
    labels = asso_gt[jnp.clip(match_cues, 0)]                         # (N, T), n_per = bg
    valid = (labels != n_per) & src_mask[:, None]                     # non-bg matched targets
    num_objs = jnp.sum(valid.astype(jnp.float32))
    row_mask = src_mask.astype(jnp.float32)

    # column of the target logit for each (row, frame); bg rows masked by `valid`
    cols = (jnp.arange(T, dtype=jnp.int32)[None, :] * n_per
            + jnp.minimum(labels, n_per - 1))                         # (N, T)

    loss = jnp.float32(0.0)
    for pred in asso_preds:
        pred = pred.astype(jnp.float32)
        lse_sum = ce_lse_sum(pred, row_mask, n_per, T)                # Pallas kernel 2
        picked = jnp.take_along_axis(pred, cols, axis=1)              # tiny gather, plain JAX
        dot = jnp.sum(jnp.where(valid, picked, 0.0))
        loss = loss + (lse_sum - dot) / (num_objs + epsilon)
    return loss * asso_weight


# ----------------------------------------------------------------------------
# Pure-numpy reference mirroring the PyTorch code (for verification)
# ----------------------------------------------------------------------------
def numpy_reference(asso_preds, pred_box, times, gt_ids, n_t, epsilon=1e-4, asso_weight=1.0):
    pb = np.asarray(pred_box, np.float32)
    N = pb.shape[0]
    x1, y1, x2, y2 = pb[:, 0], pb[:, 1], pb[:, 2], pb[:, 3]
    lt_x = np.maximum(x1[:, None], x1[None, :]); rb_x = np.minimum(x2[:, None], x2[None, :])
    lt_y = np.maximum(y1[:, None], y1[None, :]); rb_y = np.minimum(y2[:, None], y2[None, :])
    inter = np.clip(rb_x - lt_x, 0, None) * np.clip(rb_y - lt_y, 0, None)
    area = (x2 - x1) * (y2 - y1)
    ious = inter / (area[:, None] + area[None, :] - inter)
    tarr = np.asarray(times)
    ious[tarr[:, None] != tarr[None, :]] = -1.0

    ids = np.asarray(gt_ids)
    inst_ids = np.unique(ids[ids > -1])
    K, T = len(inst_ids), len(n_t)
    offsets = np.concatenate([[0], np.cumsum(n_t)])
    match_cues = np.full((N,), -1, np.int64)
    asso_gt = np.zeros((K, T), np.int64)
    for k, inst_id in enumerate(inst_ids):
        tcols = ids == inst_id
        for t in range(T):
            iou_t = ious[offsets[t]:offsets[t + 1]][:, tcols]
            if iou_t.size == 0:
                asso_gt[k, t] = n_t[t]
                continue
            val = iou_t.max(axis=0); inds = iou_t.argmax(axis=0)
            ind = inds[val > 0]
            if len(ind) == 1:
                obj = int(ind[0])
                asso_gt[k, t] = obj
                match_cues[offsets[t] + obj] = k
            else:
                asso_gt[k, t] = n_t[t]

    src = np.where(match_cues >= 0)[0]
    tgt = match_cues[src]
    total = 0.0
    for pred in asso_preds:
        pred = np.asarray(pred, np.float32)
        loss = np.zeros(len(src), np.float64)
        num_objs = 0.0
        for t in range(T):
            logits = np.concatenate(
                [pred[:, offsets[t]:offsets[t + 1]],
                 np.zeros((pred.shape[0], 1), np.float32)], axis=1)[src]
            lab = asso_gt[tgt, t]
            num_objs += float((lab != n_t[t]).sum())
            m = logits.max(axis=1, keepdims=True)
            lse = m[:, 0] + np.log(np.exp(logits - m).sum(axis=1))
            loss += lse - logits[np.arange(len(src)), lab]
        total += loss.sum() / (num_objs + epsilon)
    return total * asso_weight


if __name__ == "__main__":
    T, n_per = 4, 4            # 4 frames, 4 detections per frame
    N = T * n_per              # total detections = 16
    M = N                      # query instances (rows of asso_pred)

    key = jax.random.PRNGKey(0)
    k1, k2, k3 = jax.random.split(key, 3)
    xy = jax.random.uniform(k1, (N, 1, 2), minval=0.0, maxval=10.0)
    wh = jax.random.uniform(k2, (N, 1, 2), minval=1.0, maxval=5.0)
    boxes = jnp.concatenate([xy, xy + wh], axis=-1)        # (N, 1, 4) anchored boxes
    times = jnp.asarray(np.repeat(np.arange(T), n_per), jnp.int32)   # frame index per det

    # gt track ids per detection; each id appears at most once per frame, -1 = unlabeled
    gt_ids_np = np.array([0, 1, 2, 3,
                          1, 0, 3, -1,
                          2, 3, 0, 1,
                          -1, 2, 1, 0], np.int32)
    gt_ids = jnp.asarray(gt_ids_np)
    inst_ids = jnp.asarray(np.unique(gt_ids_np[gt_ids_np > -1]).astype(np.int32))

    asso_preds = [jax.random.normal(k, (M, N), jnp.float32)
                  for k in jax.random.split(k3, 2)]        # e.g. 2 decoder layers

    loss = asso_loss(asso_preds, boxes, times, gt_ids, inst_ids, n_per, T,
                     neg_unmatched=False, epsilon=1e-4, asso_weight=1.0)
    loss = jax.block_until_ready(loss)

    ref = numpy_reference([np.asarray(p) for p in asso_preds],
                          np.asarray(jnp.nanmean(boxes, axis=1)),
                          np.asarray(times), gt_ids_np, [n_per] * T)
    assert np.allclose(float(loss), ref, rtol=1e-3, atol=1e-3), (float(loss), ref)
    print("KERNEL_OK")
</pallas_src>

<mosaic_0001>
module attributes {stable_mosaic.version = 11 : i64} {
  func.func @_iou_kernel(%arg0: i32, %arg1: memref<16x1xf32, #tpu.memory_space<vmem>>, %arg2: memref<16x1xf32, #tpu.memory_space<vmem>>, %arg3: memref<16x1xf32, #tpu.memory_space<vmem>>, %arg4: memref<16x1xf32, #tpu.memory_space<vmem>>, %arg5: memref<16x1xi32, #tpu.memory_space<vmem>>, %arg6: memref<1x128xf32, #tpu.memory_space<vmem>>, %arg7: memref<1x128xf32, #tpu.memory_space<vmem>>, %arg8: memref<1x128xf32, #tpu.memory_space<vmem>>, %arg9: memref<1x128xf32, #tpu.memory_space<vmem>>, %arg10: memref<1x128xi32, #tpu.memory_space<vmem>>, %arg11: memref<16x128xf32, #tpu.memory_space<vmem>>) attributes {dimension_semantics = [#tpu.dimension_semantics<parallel>], iteration_bounds = array<i64: 1>, scalar_prefetch = 0 : i64, scratch_operands = 0 : i64, tpu.core_type = #tpu.core_type<tc>, window_params = [{transform_indices = @transform_0, window_bounds = array<i64: 16, 1>}, {transform_indices = @transform_1, window_bounds = array<i64: 16, 1>}, {transform_indices = @transform_2, window_bounds = array<i64: 16, 1>}, {transform_indices = @transform_3, window_bounds = array<i64: 16, 1>}, {transform_indices = @transform_4, window_bounds = array<i64: 16, 1>}, {pipeline_mode = #tpu.pipeline_mode<synchronous>, transform_indices = @transform_5, window_bounds = array<i64: 1, 128>}, {pipeline_mode = #tpu.pipeline_mode<synchronous>, transform_indices = @transform_6, window_bounds = array<i64: 1, 128>}, {pipeline_mode = #tpu.pipeline_mode<synchronous>, transform_indices = @transform_7, window_bounds = array<i64: 1, 128>}, {pipeline_mode = #tpu.pipeline_mode<synchronous>, transform_indices = @transform_8, window_bounds = array<i64: 1, 128>}, {pipeline_mode = #tpu.pipeline_mode<synchronous>, transform_indices = @transform_9, window_bounds = array<i64: 1, 128>}, {transform_indices = @transform_10, window_bounds = array<i64: 16, 128>}]} {
    %c0 = arith.constant 0 : index
    %c0_0 = arith.constant 0 : index
    %0 = vector.load %arg1[%c0, %c0_0] : memref<16x1xf32, #tpu.memory_space<vmem>>, vector<16x1xf32>
    %c0_1 = arith.constant 0 : index
    %c0_2 = arith.constant 0 : index
    %1 = vector.load %arg2[%c0_1, %c0_2] : memref<16x1xf32, #tpu.memory_space<vmem>>, vector<16x1xf32>
    %c0_3 = arith.constant 0 : index
    %c0_4 = arith.constant 0 : index
    %2 = vector.load %arg3[%c0_3, %c0_4] : memref<16x1xf32, #tpu.memory_space<vmem>>, vector<16x1xf32>
    %c0_5 = arith.constant 0 : index
    %c0_6 = arith.constant 0 : index
    %3 = vector.load %arg4[%c0_5, %c0_6] : memref<16x1xf32, #tpu.memory_space<vmem>>, vector<16x1xf32>
    %c0_7 = arith.constant 0 : index
    %c0_8 = arith.constant 0 : index
    %4 = vector.load %arg6[%c0_7, %c0_8] : memref<1x128xf32, #tpu.memory_space<vmem>>, vector<1x128xf32>
    %c0_9 = arith.constant 0 : index
    %c0_10 = arith.constant 0 : index
    %5 = vector.load %arg7[%c0_9, %c0_10] : memref<1x128xf32, #tpu.memory_space<vmem>>, vector<1x128xf32>
    %c0_11 = arith.constant 0 : index
    %c0_12 = arith.constant 0 : index
    %6 = vector.load %arg8[%c0_11, %c0_12] : memref<1x128xf32, #tpu.memory_space<vmem>>, vector<1x128xf32>
    %c0_13 = arith.constant 0 : index
    %c0_14 = arith.constant 0 : index
    %7 = vector.load %arg9[%c0_13, %c0_14] : memref<1x128xf32, #tpu.memory_space<vmem>>, vector<1x128xf32>
    %8 = vector.broadcast %0 : vector<16x1xf32> to vector<16x128xf32>
    %9 = vector.broadcast %4 : vector<1x128xf32> to vector<16x128xf32>
    %10 = arith.maximumf %8, %9 : vector<16x128xf32>
    %11 = vector.broadcast %1 : vector<16x1xf32> to vector<16x128xf32>
    %12 = vector.broadcast %5 : vector<1x128xf32> to vector<16x128xf32>
    %13 = arith.maximumf %11, %12 : vector<16x128xf32>
    %14 = vector.broadcast %2 : vector<16x1xf32> to vector<16x128xf32>
    %15 = vector.broadcast %6 : vector<1x128xf32> to vector<16x128xf32>
    %16 = arith.minimumf %14, %15 : vector<16x128xf32>
    %17 = vector.broadcast %3 : vector<16x1xf32> to vector<16x128xf32>
    %18 = vector.broadcast %7 : vector<1x128xf32> to vector<16x128xf32>
    %19 = arith.minimumf %17, %18 : vector<16x128xf32>
    %20 = arith.subf %16, %10 : vector<16x128xf32>
    %cst = arith.constant 0.000000e+00 : f32
    %21 = vector.broadcast %cst : f32 to vector<16x128xf32>
    %22 = arith.maximumf %20, %21 : vector<16x128xf32>
    %23 = arith.subf %19, %13 : vector<16x128xf32>
    %cst_15 = arith.constant 0.000000e+00 : f32
    %24 = vector.broadcast %cst_15 : f32 to vector<16x128xf32>
    %25 = arith.maximumf %23, %24 : vector<16x128xf32>
    %26 = arith.mulf %22, %25 : vector<16x128xf32>
    %27 = arith.subf %2, %0 : vector<16x1xf32>
    %28 = arith.subf %3, %1 : vector<16x1xf32>
    %29 = arith.mulf %27, %28 : vector<16x1xf32>
    %30 = arith.subf %6, %4 : vector<1x128xf32>
    %31 = arith.subf %7, %5 : vector<1x128xf32>
    %32 = arith.mulf %30, %31 : vector<1x128xf32>
    %33 = vector.broadcast %29 : vector<16x1xf32> to vector<16x128xf32>
    %34 = vector.broadcast %32 : vector<1x128xf32> to vector<16x128xf32>
    %35 = arith.addf %33, %34 : vector<16x128xf32>
    %36 = arith.subf %35, %26 : vector<16x128xf32>
    %37 = tpu.reciprocal %36 {approx = true} : vector<16x128xf32> -> vector<16x128xf32>
    %38 = arith.mulf %26, %37 : vector<16x128xf32>
    %c0_16 = arith.constant 0 : index
    %c0_17 = arith.constant 0 : index
    %39 = vector.load %arg5[%c0_16, %c0_17] : memref<16x1xi32, #tpu.memory_space<vmem>>, vector<16x1xi32>
    %c0_18 = arith.constant 0 : index
    %c0_19 = arith.constant 0 : index
    %40 = vector.load %arg10[%c0_18, %c0_19] : memref<1x128xi32, #tpu.memory_space<vmem>>, vector<1x128xi32>
    %41 = vector.broadcast %39 : vector<16x1xi32> to vector<16x128xi32>
    %42 = vector.broadcast %40 : vector<1x128xi32> to vector<16x128xi32>
    %43 = arith.cmpi eq, %41, %42 : vector<16x128xi32>
    %cst_20 = arith.constant -1.000000e+00 : f32
    %44 = vector.broadcast %cst_20 : f32 to vector<16x128xf32>
    %45 = arith.select %43, %38, %44 : vector<16x128xi1>, vector<16x128xf32>
    %c0_21 = arith.constant 0 : index
    %c0_22 = arith.constant 0 : index
    %46 = vector.load %arg11[%c0_21, %c0_22] : memref<16x128xf32, #tpu.memory_space<vmem>>, vector<16x128xf32>
    tpu.vector_store %arg11[%c0_21, %c0_22], %45 {strides = array<i32>} : memref<16x128xf32, #tpu.memory_space<vmem>>, vector<16x128xf32>,
    return
  }
  func.func @transform_0(%arg0: i32) -> (i32, i32) {
    %c0_i32 = arith.constant 0 : i32
    %c0_i32_0 = arith.constant 0 : i32
    return %arg0, %c0_i32 : i32, i32
  }
  func.func @transform_1(%arg0: i32) -> (i32, i32) {
    %c0_i32 = arith.constant 0 : i32
    %c0_i32_0 = arith.constant 0 : i32
    return %arg0, %c0_i32 : i32, i32
  }
  func.func @transform_2(%arg0: i32) -> (i32, i32) {
    %c0_i32 = arith.constant 0 : i32
    %c0_i32_0 = arith.constant 0 : i32
    return %arg0, %c0_i32 : i32, i32
  }
  func.func @transform_3(%arg0: i32) -> (i32, i32) {
    %c0_i32 = arith.constant 0 : i32
    %c0_i32_0 = arith.constant 0 : i32
    return %arg0, %c0_i32 : i32, i32
  }
  func.func @transform_4(%arg0: i32) -> (i32, i32) {
    %c0_i32 = arith.constant 0 : i32
    %c0_i32_0 = arith.constant 0 : i32
    return %arg0, %c0_i32 : i32, i32
  }
  func.func @transform_5(%arg0: i32) -> (i32, i32) {
    %c0_i32 = arith.constant 0 : i32
    %c0_i32_0 = arith.constant 0 : i32
    %c0_i32_1 = arith.constant 0 : i32
    return %c0_i32, %c0_i32_0 : i32, i32
  }
  func.func @transform_6(%arg0: i32) -> (i32, i32) {
    %c0_i32 = arith.constant 0 : i32
    %c0_i32_0 = arith.constant 0 : i32
    %c0_i32_1 = arith.constant 0 : i32
    return %c0_i32, %c0_i32_0 : i32, i32
  }
  func.func @transform_7(%arg0: i32) -> (i32, i32) {
    %c0_i32 = arith.constant 0 : i32
    %c0_i32_0 = arith.constant 0 : i32
    %c0_i32_1 = arith.constant 0 : i32
    return %c0_i32, %c0_i32_0 : i32, i32
  }
  func.func @transform_8(%arg0: i32) -> (i32, i32) {
    %c0_i32 = arith.constant 0 : i32
    %c0_i32_0 = arith.constant 0 : i32
    %c0_i32_1 = arith.constant 0 : i32
    return %c0_i32, %c0_i32_0 : i32, i32
  }
  func.func @transform_9(%arg0: i32) -> (i32, i32) {
    %c0_i32 = arith.constant 0 : i32
    %c0_i32_0 = arith.constant 0 : i32
    %c0_i32_1 = arith.constant 0 : i32
    return %c0_i32, %c0_i32_0 : i32, i32
  }
  func.func @transform_10(%arg0: i32) -> (i32, i32) {
    %c0_i32 = arith.constant 0 : i32
    %c0_i32_0 = arith.constant 0 : i32
    return %arg0, %c0_i32 : i32, i32
  }
}

</mosaic_0001>

<bundles_post_ra>
// kernel: tpu_custom_call.1
= control target key start
LH: loop header
LB: loop body
LE: loop exit
PB: predicated region body
PF: predicated region fallthrough
CT: control target
= control target key end

     0   :  { %v233_v2 = vmov 0   ;;  %s349_s0 = inlined_call_operand.vmem [shape: f32[16,1], index: 0, kind: input, shape index: {}]   ;;  %s350_s1 = inlined_call_operand.vmem [shape: f32[16,1], index: 1, kind: input, shape index: {}]   ;;  %s351_s2 = inlined_call_operand.vmem [shape: f32[16,1], index: 2, kind: input, shape index: {}]   ;;  %s352_s3 = inlined_call_operand.vmem [shape: f32[16,1], index: 3, kind: input, shape index: {}]   ;;  %s353_s4 = inlined_call_operand.vmem [shape: s32[16,1], index: 4, kind: input, shape index: {}]   ;;  %s354_s5 = inlined_call_operand.vmem [shape: f32[1,128], index: 5, kind: input, shape index: {}]   ;;  %s355_s6 = inlined_call_operand.vmem [shape: f32[1,128], index: 6, kind: input, shape index: {}]   ;;  %s356_s7 = inlined_call_operand.vmem [shape: f32[1,128], index: 7, kind: input, shape index: {}]   ;;  %s357_s8 = inlined_call_operand.vmem [shape: f32[1,128], index: 8, kind: input, shape index: {}]   ;;  %s358_s9 = inlined_call_operand.vmem [shape: s32[1,128], index: 9, kind: input, shape index: {}]   ;;  %s359_s10 = inlined_call_operand.hbm [shape: f32[16,128], index: 10, kind: output, shape index: {}]  }
   0x1   :  { %v38_v0 = vld [vmem:[%s350_s1] sm:$0xff]  ;;  %204 = vset.pattern.permute.xlu1 %v233_v2  ;;  %203 = vset.pattern.permute.xlu0 %v233_v2  ;;  %v39_v3 = vld [vmem:[%s350_s1 + $0x8] sm:$0xff] }
   0x2   :  { %v36_v1 = vld [vmem:[%s349_s0] sm:$0xff]  ;;  %68 = vperm.xlu1 %204, %v38_v0   ;;  %v37_v4 = vld [vmem:[%s349_s0 + $0x8] sm:$0xff] }
   0x3   :  { %50 = vperm.xlu0 %203, %v36_v1  }
   0x4   :  { %15 = vsyncpa [#allocation3], 0  ;;  %v42_v5 = vld [vmem:[%s352_s3] sm:$0xff]  ;;  %v41_v7 = vld [vmem:[%s351_s2 + $0x8] sm:$0xff]  ;;  %v59_v17 = vlaneseq }
   0x5   :  { %v40_v6 = vld [vmem:[%s351_s2] sm:$0xff]  ;;  %v43_v8 = vld [vmem:[%s352_s3 + $0x8] sm:$0xff]  ;;  %v132_v9 = vsub.f32 %v42_v5, %v38_v0  ;;  %v131_v11 = vsub.f32 %v41_v7, %v37_v4 }
   0x6   :  { %73 = vperm.xlu1 %204, %v39_v3   ;;  %v130_v10 = vsub.f32 %v40_v6, %v36_v1  ;;  %v133_v12 = vsub.f32 %v43_v8, %v39_v3  ;;  %v164_v15 = vld [vmem:[%s353_s4 + $0x8] sm:$0xff]  ;;  %v163_v16 = vld [vmem:[%s353_s4] sm:$0xff]  ;;  %v60_v18 = vshrl.u32 %v59_v17, 7 }
   0x7   :  { %55 = vperm.xlu0 %203, %v37_v4   ;;  %v46_v21 = vld [vmem:[%s356_s7] sm:$0x1]  ;;  %s234_s7 = smov [#allocation2]  }
   0x8   :  { %v134_v13 = vmul.f32 %v132_v9, %v130_v10  ;;  %v135_v14 = vmul.f32 %v133_v12, %v131_v11  ;;  %v61_v22 = vsub.s32 0, %v60_v18  ;;  %v44_v23 = vld [vmem:[%s354_s5] sm:$0x1] }
   0x9   :  { %v47_v26 = vld [vmem:[%s357_s8] sm:$0x1]  ;;  %v136_v30 = vsub.f32 %v46_v21, %v44_v23  ;;  %s187_s8 = sshll.u32 %s234_s7, 4  ;;  %s188_s8 = int_to_ptr.vmem [resolvable:$true] %s187_s8 }
   0xa   :  { %91 = vperm.xlu1 %204, %v41_v7   ;;  %v45_v27 = vld [vmem:[%s355_s6] sm:$0x1]  ;;  %v98_v28 = vrot.slane %v46_v21, %v61_v22  ;;  %v62_v29 = vrot.slane %v44_v23, %v61_v22  ;;  %v116_v37 = vrot.slane %v47_v26, %v61_v22  ;;  %s209_s16 = scalar_lea.vmem %s188_s8, 256  ;;  %p214_p1 = scmp.lt.s32.totalorder %s188_s8, %s188_s8 }
   0xb   :  { %86 = vperm.xlu0 %203, %v40_v6   ;;  %v137_v31 = vsub.f32 %v47_v26, %v45_v27  ;;  %v80_v32 = vrot.slane %v45_v27, %v61_v22  ;;  %v198_v0 = vld [vmem:[%s358_s9] ss:$0 sm:$0xff]  ;;  %p210_p0 = scmp.ne.s32.totalorder %s188_s8, %s209_s16  ;;  %p215_p2 = scmp.lt.s32.totalorder %s209_s16, %s209_s16 }
   0xd   :  { %v138_v40 = vmul.f32 %v137_v31, %v136_v30  ;;  %p216_p3 = por %p215_p2, %p214_p1 }
   0xe   :  { %109 = vperm.xlu1 %204, %v43_v8  }
   0xf   :  { %104 = vperm.xlu0 %203, %v42_v5   ;;  %v153_v51 = vrot.slane %v138_v40, %v61_v22  ;;  %p217_p4 = pnand %p216_p3, %p210_p0 }
  0x12   :  { %146 = vperm.xlu1 %204, %v135_v14  }
  0x13   :  { %141 = vperm.xlu0 %203, %v134_v13  }
  0x16   :  { %170 = vperm.xlu1 %204, %v164_v15  }
  0x17   :  { %167 = vperm.xlu0 %203, %v163_v16  }
  0x81   :  { %v69_v19 = vpop.permute.xlu1 %68 }
  0x82   :  { %v51_v20 = vpop.permute.xlu0 %50  ;;  %v82_v41 = vmax.f32 %v69_v19, %v80_v32 }
  0x83   :  { %v64_v38 = vmax.f32 %v51_v20, %v62_v29 }
  0x85   :  { %v74_v24 = vpop.permute.xlu1 %73 }
  0x86   :  { %v56_v25 = vpop.permute.xlu0 %55  ;;  %v83_v42 = vmax.f32 %v74_v24, %v80_v32 }
  0x87   :  { %v65_v39 = vmax.f32 %v56_v25, %v62_v29 }
  0x89   :  { %v92_v33 = vpop.permute.xlu1 %91 }
  0x8a   :  { %v87_v34 = vpop.permute.xlu0 %86  ;;  %v101_v35 = vmin.f32 %v92_v33, %v98_v28 }
  0x8b   :  { %v100_v36 = vmin.f32 %v87_v34, %v98_v28 }
  0x8c   :  { %v121_v45 = vsub.f32 %v101_v35, %v65_v39 }
  0x8d   :  { %v110_v43 = vpop.permute.xlu1 %109  ;;  %v120_v46 = vsub.f32 %v100_v36, %v64_v38 }
  0x8e   :  { %v105_v44 = vpop.permute.xlu0 %104  ;;  %v119_v47 = vmin.f32 %v110_v43, %v116_v37  ;;  %v123_v54 = vmax.f32 %v121_v45, 0.0 }
  0x8f   :  { %v118_v48 = vmin.f32 %v105_v44, %v116_v37  ;;  %v122_v55 = vmax.f32 %v120_v46, 0.0 }
  0x90   :  { %v125_v49 = vsub.f32 %v119_v47, %v83_v42 }
  0x91   :  { %v124_v50 = vsub.f32 %v118_v48, %v82_v41  ;;  %v147_v52 = vpop.permute.xlu1 %146 }
  0x92   :  { %v142_v53 = vpop.permute.xlu0 %141  ;;  %v127_v56 = vmax.f32 %v125_v49, 0.0  ;;  %v156_v59 = vadd.f32 %v153_v51, %v147_v52 }
  0x93   :  { %v126_v57 = vmax.f32 %v124_v50, 0.0  ;;  %v155_v61 = vadd.f32 %v153_v51, %v142_v53 }
  0x94   :  { %v129_v58 = vmul.f32 %v127_v56, %v123_v54 }
  0x95   :  { %v128_v60 = vmul.f32 %v126_v57, %v122_v55  ;;  %v171_v1 = vpop.permute.xlu1 %170 }
  0x96   :  { %v158_v62 = vsub.f32 %v156_v59, %v129_v58  ;;  %v168_v3 = vpop.permute.xlu0 %167  ;;  %vm177_vm0 = vcmp.eq.s32.totalorder %v171_v1, %v198_v0 }
  0x97   :  { %v157_v63 = vsub.f32 %v155_v61, %v128_v60  ;;  %vm176_vm1 = vcmp.eq.s32.totalorder %v168_v3, %v198_v0 }
  0x98   :  { %205 = vrcp.f32 %v158_v62 }
  0x99   :  { %207 = vrcp.f32 %v157_v63 }
  0xa2   :  { %v206_v2 = vpop.eup %205 }
  0xa3   :  { %v208_v4 = vpop.eup %207  ;;  %v162_v5 = vmul.f32 %v206_v2, %v129_v58 }
  0xa4   :  { %v161_v6 = vmul.f32 %v208_v4, %v128_v60 }
  0xa5   :  { %v179_v7 = vsel %vm177_vm0, %v162_v5, -1.0 }
  0xa6   :  { %181 = vst [vmem:[#allocation2 + $0x8] sm:$0xff] %v179_v7  ;;  %v178_v8 = vsel %vm176_vm1, %v161_v6, -1.0 }
  0xa7   :  { %180 = vst [vmem:[#allocation2] sm:$0xff] %v178_v8 }
  0xa8   :  { %220 = shalt.err (!%p217_p4)
}
  0xa9   :  { %s221_s18 = scalar_lea.hbm %s359_s10, 256 }
  0xaa   :  { %p222_p5 = scmp.ne.s32.totalorder %s359_s10, %s221_s18  ;;  %p225_p6 = scmp.lt.u32.totalorder %s221_s18, %s359_s10 }
  0xac   :  { %p227_p7 = pnand %p225_p6, %p222_p5 }
  0xae   :  { %230 = shalt.err (!%p227_p7)
}
  0xaf   :  { %s235_s23 = smov 128   ;;  %s236_s24 = smov 8  }
  0xb0   :  { %193 = dma.vmem_to_hbm [thread:$0]  %s188_s8, 256, %s359_s10, [#allocation3], %s235_s23, %s235_s23, %s236_s24  }
  0xb1   :  { %231 = dma.done.wait [#allocation3], 256  }
  0xb2   :  { %232 = vsyncadd [#allocation3], 4294967040 }
  0xb3   :  { %197 = vsyncpa [#allocation3], 1 }

</bundles_post_ra>
